<compile_context>
chip_gen: v6e
topology: v6e:2x2x1
jax: 0.10.0
libtpu: 0.0.40
codegen_flags: <defaults>
</compile_context>

<pallas_src>
import jax
import jax.numpy as jnp
from jax.experimental import pallas as pl
from jax.experimental.pallas import tpu as pltpu


def _round_up(x, m):
    return ((x + m - 1) // m) * m


TM_MAX = 2048  # sweepable; per-step working set at 2048 is well under VMEM limits


def _pick_tile(m):
    """Spatial tile size (lane axis). Prefer >=2 grid steps for v7x megacore."""
    if m <= 512:
        return _round_up(m, 128)
    return min(TM_MAX, _round_up((m + 1) // 2, 128))


# ----------------------------------------------------------------------------
# Fused main kernel: folded mask matmul -> sigmoid -> semantic scores -> argmax
# ----------------------------------------------------------------------------
def _fused_main_kernel(x_ref, weff_ref, beff_ref, hplq_ref, cl_ref,
                       masks_ref, seg_ref, pred_ref):
    # x:    [K, TM] bf16  (im2col patches, channel-major, lane-dense)
    # weff: [Q, K]  bf16   beff: [Q, 1] f32   (folded patch/pixel/mask-embed)
    # hplq: [L, Q]  f32    cl:   [L, 1] f32   (0.5*probs and 0.5*rowsum(probs))
    # outputs: masks [Q, TM] bf16, seg [L, TM] bf16, pred [1, TM] int32
    masks = jnp.dot(weff_ref[...], x_ref[...],
                    preferred_element_type=jnp.float32) + beff_ref[...]      # [Q, TM]
    masks_ref[...] = masks.astype(masks_ref.dtype)

    # sigmoid via a single EUP op: sigmoid(x) = 0.5*tanh(0.5*x) + 0.5; the
    # affine part is pre-folded into hplq / cl, so only tanh is materialized.
    t = jnp.tanh(0.5 * masks)                                                # [Q, TM]

    # semantic scores = probs_lq @ sigmoid(masks) = hplq @ tanh + cl
    seg = jnp.dot(hplq_ref[...], t,
                  preferred_element_type=jnp.float32) + cl_ref[...]          # [L, TM]
    seg_ref[...] = seg.astype(seg_ref.dtype)

    # argmax over classes, first-occurrence tie-break (like torch.argmax)
    num_l = seg.shape[0]
    idx = jax.lax.broadcasted_iota(jnp.int32, seg.shape, 0)
    mx = jnp.max(seg, axis=0, keepdims=True)
    pred = jnp.min(jnp.where(seg == mx, idx, jnp.int32(num_l)),
                   axis=0, keepdims=True)
    pred_ref[...] = pred.astype(jnp.int32)


def pallas_fused_main(x, w_eff, b_eff, hplq, cl, *, tm):
    K, M_pad = x.shape
    Q = w_eff.shape[0]
    L = hplq.shape[0]
    grid = (M_pad // tm,)

    flops = 2 * M_pad * (Q * K + L * Q)
    transcendentals = M_pad * Q                                  # one tanh / mask elem
    bytes_accessed = (K * M_pad * 2                              # bf16 patches in
                      + (Q + L) * M_pad * 2 + M_pad * 4          # bf16 outs + int32 argmax
                      + Q * K * 2 + (Q + L * Q + L) * 4)         # resident weights

    return pl.pallas_call(
        _fused_main_kernel,
        out_shape=(
            jax.ShapeDtypeStruct((Q, M_pad), jnp.bfloat16),   # mask logits
            jax.ShapeDtypeStruct((L, M_pad), jnp.bfloat16),   # semantic scores
            jax.ShapeDtypeStruct((1, M_pad), jnp.int32),      # semantic argmax
        ),
        grid=grid,
        in_specs=[
            pl.BlockSpec((K, tm), lambda i: (0, i)),          # streamed patches
            pl.BlockSpec((Q, K), lambda i: (0, 0)),           # resident folded weight
            pl.BlockSpec((Q, 1), lambda i: (0, 0)),
            pl.BlockSpec((L, Q), lambda i: (0, 0)),
            pl.BlockSpec((L, 1), lambda i: (0, 0)),
        ],
        out_specs=(
            pl.BlockSpec((Q, tm), lambda i: (0, i)),
            pl.BlockSpec((L, tm), lambda i: (0, i)),
            pl.BlockSpec((1, tm), lambda i: (0, i)),
        ),
        compiler_params=pltpu.CompilerParams(
            # "parallel" shards the spatial axis across v7x's two TensorCores;
            # _pick_tile keeps the grid >= 2 steps whenever there is enough work.
            dimension_semantics=("parallel",),
            vmem_limit_bytes=32 * 1024 * 1024,
        ),
        cost_estimate=pl.CostEstimate(
            flops=flops,
            transcendentals=transcendentals,
            bytes_accessed=bytes_accessed,
        ),
    )(x, w_eff, b_eff, hplq, cl)


# ----------------------------------------------------------------------------
# Parameter init (deterministic, synthetic — no checkpoint loading)
# ----------------------------------------------------------------------------
def init_params(key, *, in_ch=3, patch=4, hidden=32, mask_dim=32,
                num_queries=8, num_classes=5):
    # Mirrors the wrapper's bookkeeping:
    #   self.num_classes = num_classes + 1
    #   class_predictor  = Linear(hidden, self.num_classes + 1)
    num_labels = num_classes + 1          # = 6
    cls_out = num_labels + 1              # = 7 (includes "no object")

    ks = jax.random.split(key, 6)

    def lin(k, fan_in, fan_out):
        w = jax.random.normal(k, (fan_in, fan_out), jnp.float32) / jnp.sqrt(
            jnp.float32(fan_in))
        b = jnp.zeros((fan_out,), jnp.float32)
        return w, b

    patch_w, patch_b = lin(ks[0], in_ch * patch * patch, hidden)  # patch embed
    pix_w, pix_b = lin(ks[1], hidden, mask_dim)                   # pixel decoder proj
    cls_w, cls_b = lin(ks[2], hidden, cls_out)                    # class_predictor
    me_w, me_b = lin(ks[3], hidden, mask_dim)                     # mask embedder
    query_embed = jax.random.normal(ks[4], (num_queries, hidden), jnp.float32)

    return dict(
        patch=patch, hidden=hidden, mask_dim=mask_dim,
        num_queries=num_queries, num_labels=num_labels, cls_out=cls_out,
        patch_w=patch_w, patch_b=patch_b,
        pix_w=pix_w, pix_b=pix_b,
        cls_w=cls_w, cls_b=cls_b,
        me_w=me_w, me_b=me_b,
        query_embed=query_embed,
    )


# ----------------------------------------------------------------------------
# Forward (inference path, mask_labels=None)
# ----------------------------------------------------------------------------
def mask2former_forward(params, pixel_values):
    """pixel_values: [B, C, H, W] (NCHW, like PyTorch)."""
    B, C, H, W = pixel_values.shape
    P = params["patch"]
    Hp, Wp = H // P, W // P
    M = B * Hp * Wp
    Q = params["num_queries"]
    L = params["num_labels"]
    L1 = params["cls_out"]
    K = C * P * P

    # --- trace-time query head + weight folding (plain JAX, f32) -------------
    qe = params["query_embed"]                                        # [Q, D]
    cls_q = qe @ params["cls_w"] + params["cls_b"]                    # [Q, L1]
    probs_q = jax.nn.softmax(cls_q, axis=-1)                          # [Q, L1]
    probs_lq = probs_q[:, :L].T                                       # [L, Q] (drop null)
    hplq = 0.5 * probs_lq                                             # [L, Q]
    cl = 0.5 * jnp.sum(probs_lq, axis=1, keepdims=True)               # [L, 1]

    me_q = qe @ params["me_w"] + params["me_b"]                       # [Q, Cm]
    w12 = params["patch_w"] @ params["pix_w"]                         # [K, Cm]
    w_eff = (me_q @ w12.T).astype(jnp.bfloat16)                       # [Q, K]
    b_eff = (me_q @ (params["pix_w"].T @ params["patch_b"]
                     + params["pix_b"])).reshape(Q, 1)                # [Q, 1] f32

    # --- glue: channel-major im2col of non-overlapping PxP patches -----------
    #     cast to bf16 BEFORE the shuffle so the XLA pre-pass moves half the bytes
    x = (pixel_values.astype(jnp.bfloat16)
         .reshape(B, C, Hp, P, Wp, P)
         .transpose(1, 3, 5, 0, 2, 4)
         .reshape(K, M))

    tm = _pick_tile(M)
    M_pad = _round_up(M, tm)
    if M_pad != M:
        x = jnp.pad(x, ((0, 0), (0, M_pad - M)))

    # --- fused main kernel: folded matmul -> sigmoid -> semantic -> argmax ---
    masks_qm, seg_lm, pred_m = pallas_fused_main(
        x, w_eff, b_eff, hplq, cl, tm=tm)
    masks_qm = masks_qm[:, :M]
    seg_lm = seg_lm[:, :M]
    pred_m = pred_m[:, :M]

    # --- output-shape glue (API compatibility only) ---------------------------
    masks_queries_logits = masks_qm.reshape(Q, B, Hp, Wp).transpose(1, 0, 2, 3)
    segmentation_scores = seg_lm.reshape(L, B, Hp, Wp).transpose(1, 0, 2, 3)
    semantic_map = pred_m.reshape(B, Hp, Wp)
    class_queries_logits = jnp.broadcast_to(cls_q[None], (B, Q, L1))

    return {
        "class_queries_logits": class_queries_logits,      # [B, Q, num_classes+2] f32
        "masks_queries_logits": masks_queries_logits,      # [B, Q, H/4, W/4]     bf16
        "segmentation_scores": segmentation_scores,        # [B, num_labels, H/4, W/4] bf16
        "semantic_segmentation": semantic_map,             # [B, H/4, W/4] int32
    }
    # TODO(synk): training-mode branch (mask_labels / Hungarian matching loss)
    # has no clean Pallas equivalent and is omitted.


# ----------------------------------------------------------------------------
if __name__ == "__main__":
    key = jax.random.PRNGKey(0)
    k_param, k_input = jax.random.split(key)

    B, C, H, W = 2, 3, 16, 16
    num_classes = 5

    params = init_params(k_param, in_ch=C, patch=4, hidden=32, mask_dim=32,
                         num_queries=8, num_classes=num_classes)
    pixel_values = jax.random.normal(k_input, (B, C, H, W), jnp.float32)

    out = mask2former_forward(params, pixel_values)
    out = jax.tree_util.tree_map(jax.block_until_ready, out)

    assert out["class_queries_logits"].shape == (B, 8, num_classes + 2)
    assert out["masks_queries_logits"].shape == (B, 8, H // 4, W // 4)
    assert out["segmentation_scores"].shape == (B, num_classes + 1, H // 4, W // 4)
    assert out["semantic_segmentation"].shape == (B, H // 4, W // 4)
    assert out["semantic_segmentation"].dtype == jnp.int32
    print("KERNEL_OK")
</pallas_src>

<mosaic_0001>
module attributes {stable_mosaic.version = 11 : i64} {
  func.func @_fused_main_kernel(%arg0: i32, %arg1: memref<48x128xbf16, #tpu.memory_space<vmem>>, %arg2: memref<8x48xbf16, #tpu.memory_space<vmem>>, %arg3: memref<8x1xf32, #tpu.memory_space<vmem>>, %arg4: memref<6x8xf32, #tpu.memory_space<vmem>>, %arg5: memref<6x1xf32, #tpu.memory_space<vmem>>, %arg6: memref<8x128xbf16, #tpu.memory_space<vmem>>, %arg7: memref<6x128xbf16, #tpu.memory_space<vmem>>, %arg8: memref<1x128xi32, #tpu.memory_space<vmem>>) attributes {dimension_semantics = [#tpu.dimension_semantics<parallel>], iteration_bounds = array<i64: 1>, scalar_prefetch = 0 : i64, scratch_operands = 0 : i64, tpu.core_type = #tpu.core_type<tc>, window_params = [{transform_indices = @transform_0, window_bounds = array<i64: 48, 128>}, {pipeline_mode = #tpu.pipeline_mode<synchronous>, transform_indices = @transform_1, window_bounds = array<i64: 8, 48>}, {pipeline_mode = #tpu.pipeline_mode<synchronous>, transform_indices = @transform_2, window_bounds = array<i64: 8, 1>}, {pipeline_mode = #tpu.pipeline_mode<synchronous>, transform_indices = @transform_3, window_bounds = array<i64: 6, 8>}, {pipeline_mode = #tpu.pipeline_mode<synchronous>, transform_indices = @transform_4, window_bounds = array<i64: 6, 1>}, {transform_indices = @transform_5, window_bounds = array<i64: 8, 128>}, {transform_indices = @transform_6, window_bounds = array<i64: 6, 128>}, {transform_indices = @transform_7, window_bounds = array<i64: 1, 128>}]} {
    %c0 = arith.constant 0 : index
    %c0_0 = arith.constant 0 : index
    %0 = vector.load %arg2[%c0, %c0_0] : memref<8x48xbf16, #tpu.memory_space<vmem>>, vector<8x48xbf16>
    %c0_1 = arith.constant 0 : index
    %c0_2 = arith.constant 0 : index
    %1 = vector.load %arg1[%c0_1, %c0_2] : memref<48x128xbf16, #tpu.memory_space<vmem>>, vector<48x128xbf16>
    %cst = arith.constant dense<0.000000e+00> : vector<8x128xf32>
    %2 = tpu.matmul %0, %1, %cst {dimension_numbers = #tpu.dot_dimension_numbers<[1], [0], [0], [1], [0, 0, 1, 1], [], []>} : vector<8x48xbf16>, vector<48x128xbf16>, vector<8x128xf32> -> vector<8x128xf32>
    %c0_3 = arith.constant 0 : index
    %c0_4 = arith.constant 0 : index
    %3 = vector.load %arg3[%c0_3, %c0_4] : memref<8x1xf32, #tpu.memory_space<vmem>>, vector<8x1xf32>
    %4 = vector.broadcast %3 : vector<8x1xf32> to vector<8x128xf32>
    %5 = arith.addf %2, %4 : vector<8x128xf32>
    %6 = arith.truncf %5 : vector<8x128xf32> to vector<8x128xbf16>
    %c0_5 = arith.constant 0 : index
    %c0_6 = arith.constant 0 : index
    %7 = vector.load %arg6[%c0_5, %c0_6] : memref<8x128xbf16, #tpu.memory_space<vmem>>, vector<8x128xbf16>
    tpu.vector_store %arg6[%c0_5, %c0_6], %6 {strides = array<i32>} : memref<8x128xbf16, #tpu.memory_space<vmem>>, vector<8x128xbf16>,
    %cst_7 = arith.constant 5.000000e-01 : f32
    %8 = vector.broadcast %cst_7 : f32 to vector<8x128xf32>
    %9 = arith.mulf %8, %5 : vector<8x128xf32>
    %10 = math.tanh %9 : vector<8x128xf32>
    %c0_8 = arith.constant 0 : index
    %c0_9 = arith.constant 0 : index
    %11 = vector.load %arg4[%c0_8, %c0_9] : memref<6x8xf32, #tpu.memory_space<vmem>>, vector<6x8xf32>
    %cst_10 = arith.constant dense<0.000000e+00> : vector<6x128xf32>
    %12 = tpu.matmul %11, %10, %cst_10 {dimension_numbers = #tpu.dot_dimension_numbers<[1], [0], [0], [1], [0, 0, 1, 1], [], []>} : vector<6x8xf32>, vector<8x128xf32>, vector<6x128xf32> -> vector<6x128xf32>
    %c0_11 = arith.constant 0 : index
    %c0_12 = arith.constant 0 : index
    %13 = vector.load %arg5[%c0_11, %c0_12] : memref<6x1xf32, #tpu.memory_space<vmem>>, vector<6x1xf32>
    %14 = vector.broadcast %13 : vector<6x1xf32> to vector<6x128xf32>
    %15 = arith.addf %12, %14 : vector<6x128xf32>
    %16 = arith.truncf %15 : vector<6x128xf32> to vector<6x128xbf16>
    %c0_13 = arith.constant 0 : index
    %c0_14 = arith.constant 0 : index
    %17 = vector.load %arg7[%c0_13, %c0_14] : memref<6x128xbf16, #tpu.memory_space<vmem>>, vector<6x128xbf16>
    tpu.vector_store %arg7[%c0_13, %c0_14], %16 {strides = array<i32>} : memref<6x128xbf16, #tpu.memory_space<vmem>>, vector<6x128xbf16>,
    %18 = tpu.iota {dimensions = array<i32: 0>} : vector<6x128xi32>
    %cst_15 = arith.constant dense<0xFF800000> : vector<128xf32>
    %19 = vector.multi_reduction <maximumf>, %15, %cst_15 [0] : vector<6x128xf32> to vector<128xf32>
    %20 = vector.shape_cast %19 : vector<128xf32> to vector<1x128xf32>
    %21 = vector.broadcast %20 : vector<1x128xf32> to vector<6x128xf32>
    %22 = arith.cmpf oeq, %15, %21 : vector<6x128xf32>
    %c6_i32 = arith.constant 6 : i32
    %23 = vector.broadcast %c6_i32 : i32 to vector<6x128xi32>
    %24 = arith.select %22, %18, %23 : vector<6x128xi1>, vector<6x128xi32>
    %cst_16 = arith.constant dense<2147483647> : vector<128xi32>
    %25 = vector.multi_reduction <minsi>, %24, %cst_16 [0] : vector<6x128xi32> to vector<128xi32>
    %26 = vector.shape_cast %25 : vector<128xi32> to vector<1x128xi32>
    %c0_17 = arith.constant 0 : index
    %c0_18 = arith.constant 0 : index
    %27 = vector.load %arg8[%c0_17, %c0_18] : memref<1x128xi32, #tpu.memory_space<vmem>>, vector<1x128xi32>
    tpu.vector_store %arg8[%c0_17, %c0_18], %26 {strides = array<i32>} : memref<1x128xi32, #tpu.memory_space<vmem>>, vector<1x128xi32>,
    return
  }
  func.func @transform_0(%arg0: i32) -> (i32, i32) {
    %c0_i32 = arith.constant 0 : i32
    %c0_i32_0 = arith.constant 0 : i32
    return %c0_i32, %arg0 : i32, i32
  }
  func.func @transform_1(%arg0: i32) -> (i32, i32) {
    %c0_i32 = arith.constant 0 : i32
    %c0_i32_0 = arith.constant 0 : i32
    %c0_i32_1 = arith.constant 0 : i32
    return %c0_i32, %c0_i32_0 : i32, i32
  }
  func.func @transform_2(%arg0: i32) -> (i32, i32) {
    %c0_i32 = arith.constant 0 : i32
    %c0_i32_0 = arith.constant 0 : i32
    %c0_i32_1 = arith.constant 0 : i32
    return %c0_i32, %c0_i32_0 : i32, i32
  }
  func.func @transform_3(%arg0: i32) -> (i32, i32) {
    %c0_i32 = arith.constant 0 : i32
    %c0_i32_0 = arith.constant 0 : i32
    %c0_i32_1 = arith.constant 0 : i32
    return %c0_i32, %c0_i32_0 : i32, i32
  }
  func.func @transform_4(%arg0: i32) -> (i32, i32) {
    %c0_i32 = arith.constant 0 : i32
    %c0_i32_0 = arith.constant 0 : i32
    %c0_i32_1 = arith.constant 0 : i32
    return %c0_i32, %c0_i32_0 : i32, i32
  }
  func.func @transform_5(%arg0: i32) -> (i32, i32) {
    %c0_i32 = arith.constant 0 : i32
    %c0_i32_0 = arith.constant 0 : i32
    return %c0_i32, %arg0 : i32, i32
  }
  func.func @transform_6(%arg0: i32) -> (i32, i32) {
    %c0_i32 = arith.constant 0 : i32
    %c0_i32_0 = arith.constant 0 : i32
    return %c0_i32, %arg0 : i32, i32
  }
  func.func @transform_7(%arg0: i32) -> (i32, i32) {
    %c0_i32 = arith.constant 0 : i32
    %c0_i32_0 = arith.constant 0 : i32
    return %c0_i32, %arg0 : i32, i32
  }
}

</mosaic_0001>

<bundles_post_ra>
// kernel: tpu_custom_call.1
= control target key start
LH: loop header
LB: loop body
LE: loop exit
PB: predicated region body
PF: predicated region fallthrough
CT: control target
= control target key end

     0   :  { %13 = vsyncpa [#allocation3], 0  ;;  %s469_s0 = inlined_call_operand.hbm [shape: bf16[48,128], index: 0, kind: input, shape index: {}]   ;;  %s470_s1 = inlined_call_operand.vmem [shape: bf16[8,48], index: 1, kind: input, shape index: {}]   ;;  %s471_s2 = inlined_call_operand.vmem [shape: f32[8,1], index: 2, kind: input, shape index: {}]   ;;  %s472_s3 = inlined_call_operand.vmem [shape: f32[6,8], index: 3, kind: input, shape index: {}]   ;;  %s473_s4 = inlined_call_operand.vmem [shape: f32[6,1], index: 4, kind: input, shape index: {}]   ;;  %s474_s5 = inlined_call_operand.hbm [shape: bf16[8,128], index: 5, kind: output, shape index: {0}]   ;;  %s475_s6 = inlined_call_operand.hbm [shape: bf16[6,128], index: 6, kind: output, shape index: {1}]   ;;  %s476_s7 = inlined_call_operand.hbm [shape: s32[1,128], index: 7, kind: output, shape index: {2}]  }
   0x1   :  { %14 = vsyncpa [#allocation4], 0 }
   0x2   :  { %15 = vsyncpa [#allocation7], 0  ;;  %s394_s24 = smov [#allocation2]  }
   0x3   :  { %s21_s25 = sshll.u32 %s394_s24, 4  ;;  %s22_s25 = int_to_ptr.vmem [resolvable:$true] %s21_s25 }
   0x4   :  { %s316_s26 = scalar_lea.vmem %s22_s25, 384  ;;  %p321_p1 = scmp.lt.s32.totalorder %s22_s25, %s22_s25 }
   0x5   :  { %p317_p0 = scmp.ne.s32.totalorder %s22_s25, %s316_s26  ;;  %p322_p2 = scmp.lt.s32.totalorder %s316_s26, %s316_s26 }
   0x7   :  { %p323_p3 = por %p322_p2, %p321_p1 }
   0x9   :  { %p324_p4 = pnand %p323_p3, %p317_p0 }
   0xb   :  { %327 = shalt.err (!%p324_p4)
}
   0xc   :  { %s395_s27 = smov 64   ;;  %s396_s28 = smov 4  }
   0xd   :  { %27 = dma.hbm_to_vmem [thread:$0]  %s469_s0, 384, %s22_s25, [#allocation3], %s395_s27, %s395_s27, %s396_s28  }
   0xe   :  { %388 = dma.done.wait [#allocation3], 384  }
   0xf   :  { %389 = vsyncadd [#allocation3], 4294966912  ;;  %v397_v0 = vmov 0.0   ;;  %vm398_vm0 = vmmov 0   ;;  %v399_v1 = vmov 0   ;;  %v303_v2 = vld [vmem:[#allocation2 + $0x10] sm:$0xff]  }
  0x10   :  { %278 = vmatprep.subr.bf16.mxu0 %v397_v0  ;;  %284 = vmatprep.mubr.msk.bf16.mxu0 %vm398_vm0, %v397_v0  ;;  %v304_v3 = vld [vmem:[#allocation2 + $0x8] sm:$0xff]   ;;  %v47_v4 = vld [vmem:[%s471_s2] sm:$0xff]  ;;  %vm71_vm1 = vcmask 392192   ;;  %vm126_vm2 = vcmask 64512  }
  0x11   :  { %302 = vset.pattern.permute.xlu0 %v399_v1  ;;  %288 = vmatprep.subr.mxu1 %v397_v0  ;;  %v120_v5 = vld [vmem:[%s473_s4] sm:$0x3f] }
  0x12   :  { %290 = vmatprep.mubr.msk.f32.mxu1 %vm398_vm0, %v397_v0  ;;  %279 = vmatpush3.bf16.msra.mxu0 %v303_v2  ;;  %v305_v6 = vld [vmem:[#allocation2] sm:$0xff]  }
  0x13   :  { %280 = vmatprep.subr.bf16.mxu0 %v397_v0  ;;  %50 = vperm.xlu0 %302, %v47_v4   ;;  %v40_v7 = vld [vmem:[%s470_s1] sm:$0xf]  ;;  %s400_s1 = smov [#allocation5]  }
  0x14   :  { %v119_v16 = vld [vmem:[%s472_s3] sm:$0x3f]  ;;  %s231_s13 = sshll.u32 %s400_s1, 4  ;;  %s232_s13 = int_to_ptr.vmem [resolvable:$true] %s231_s13 }
  0x15   :  { %s328_s14 = scalar_lea.vmem %s232_s13, 64  ;;  %p333_p6 = scmp.lt.s32.totalorder %s232_s13, %s232_s13 }
  0x16   :  { %281 = vmatpush3.bf16.msra.mxu0 %v304_v3  ;;  %p329_p5 = scmp.ne.s32.totalorder %s232_s13, %s328_s14  ;;  %p334_p7 = scmp.lt.s32.totalorder %s328_s14, %s328_s14 }
  0x17   :  { %282 = vmatprep.subr.bf16.mxu0 %v397_v0  ;;  %123 = vperm.xlu0 %302, %v120_v5  }
  0x18   :  { %p335_p8 = por %p334_p7, %p333_p6 }
  0x1a   :  { %283 = vmatpush3.bf16.msra.mxu0 %v305_v6  ;;  %p336_p9 = pnand %p335_p8, %p329_p5 }
  0x1d   :  { %285 = vmatmul.mubr.msk.bf16.vlgmr.msra.gmra.mxu0 %vm71_vm1, %v40_v7 }
  0x8e   :  { %v51_v8 = vpop.permute.xlu0 %50 }
  0xdd   :  { %v109_v9 = vpop.f32.mrf.mxu0 }
  0xde   :  { %v110_v10 = vadd.f32 %v109_v9, %v51_v8 }
  0xdf   :  { %v286_v11 = vpop.f32.mrf.mxu0 }
  0xe0   :  { %v115_v12 = vpack.c.bf16 %v110_v10, %v110_v10  ;;  %v117_v13 = vmul.f32 0.5, %v110_v10 }
  0xe1   :  { %v112_v14 = vpop.f32.mrf.mxu0 }
  0xe2   :  { %306 = vtanh.f32 %v117_v13  ;;  %116 = vst [vmem:[#allocation5] sm:$0xf] %v115_v12 }
  0xe3   :  { %v287_v15 = vpop.f32.mrf.mxu0 }
  0xef   :  { %v307_v17 = vpop.eup %306 }
  0xf0   :  { %289 = vmatpush3.msra.mxu1 %v307_v17 }
  0xf1   :  { %291 = vmatmul.mubr.msk.f32.vlgmr.msra.gmra.mxu1 %vm126_vm2, %v119_v16 }
  0xf2   :  { %339 = shalt.err (!%p336_p9)
}
  0xf3   :  { %234 = dma.vmem_to_hbm [thread:$0]  %s232_s13, 64, %s474_s5, [#allocation4]   ;;  %v124_v18 = vpop.permute.xlu0 %123  ;;  %vm204_vm3 = vcmask 1045504  }
  0xf4   :  { %s401_s3 = smov [#allocation6]  }
  0xf5   :  { %s241_s17 = sshll.u32 %s401_s3, 4  ;;  %s242_s17 = int_to_ptr.vmem [resolvable:$true] %s241_s17 }
  0xf6   :  { %s348_s18 = scalar_lea.vmem %s242_s17, 64  ;;  %p353_p11 = scmp.lt.s32.totalorder %s242_s17, %s242_s17 }
  0xf7   :  { %p349_p10 = scmp.ne.s32.totalorder %s242_s17, %s348_s18  ;;  %p354_p12 = scmp.lt.s32.totalorder %s348_s18, %s348_s18 }
  0xf9   :  { %p355_p13 = por %p354_p12, %p353_p11 }
  0xfb   :  { %p356_p0 = pnand %p355_p13, %p349_p10 }
 0x1b1   :  { %v196_v19 = vpop.f32.mrf.mxu1 }
 0x1b2   :  { %v197_v20 = vadd.f32 %v196_v19, %v124_v18 }
 0x1b3   :  { %v292_v21 = vpop.f32.mrf.mxu1 }
 0x1b4   :  { %v205_v22 = vsel %vm204_vm3, %v197_v20, -inf  ;;  %v200_v23 = vpack.c.bf16 %v197_v20, %v197_v20 }
 0x1b5   :  { %v206_v24 = vrot.slane %v205_v22, 4 }
 0x1b6   :  { %201 = vst [vmem:[#allocation6] sm:$0x7] %v200_v23 }
 0x1b7   :  { %v207_v25 = vmax.f32 %v205_v22, %v206_v24 }
 0x1b8   :  { %359 = shalt.err (!%p356_p0)
}
 0x1b9   :  { %244 = dma.vmem_to_hbm [thread:$0]  %s242_s17, 64, %s475_s6, [#allocation7]   ;;  %v208_v26 = vrot.slane %v207_v25, 2  ;;  %v202_v27 = vlaneseq }
 0x1ba   :  { %s402_s20 = smov [#allocation8]  }
 0x1bb   :  { %v209_v28 = vmax.f32 %v207_v25, %v208_v26  ;;  %v203_v30 = vshrl.u32 %v202_v27, 7  ;;  %s251_s21 = sshll.u32 %s402_s20, 4  ;;  %s252_s21 = int_to_ptr.vmem [resolvable:$true] %s251_s21 }
 0x1bc   :  { %s368_s6 = scalar_lea.vmem %s252_s21, 16  ;;  %s372_s22 = scalar_lea.vmem %s252_s21, 32 }
 0x1bd   :  { %v210_v29 = vrot.slane %v209_v28, 1  ;;  %p369_p1 = scmp.ne.s32.totalorder %s252_s21, %s368_s6  ;;  %p373_p2 = scmp.lt.s32.totalorder %s252_s21, %s252_s21 }
 0x1be   :  { %p374_p3 = scmp.lt.s32.totalorder %s372_s22, %s368_s6 }
 0x1bf   :  { %v211_v31 = vmax.f32 %v209_v28, %v210_v29 }
 0x1c0   :  { %p375_p4 = por %p374_p3, %p373_p2 }
 0x1c1   :  { %vm212_vm4 = vcmp.eq.f32.partialorder %v197_v20, %v211_v31 }
 0x1c2   :  { %v213_v32 = vsel %vm212_vm4, %v203_v30, 6  ;;  %p376_p5 = pnand %p375_p4, %p369_p1 }
 0x1c3   :  { %v214_v33 = vsel %vm204_vm3, %v213_v32, 2147483647 }
 0x1c4   :  { %v215_v34 = vrot.slane %v214_v33, 4 }
 0x1c6   :  { %vm216_vm5 = vcmp.lt.s32.totalorder %v214_v33, %v215_v34 }
 0x1c7   :  { %v217_v35 = vsel %vm216_vm5, %v214_v33, %v215_v34 }
 0x1c8   :  { %v218_v36 = vrot.slane %v217_v35, 2 }
 0x1ca   :  { %vm219_vm6 = vcmp.lt.s32.totalorder %v217_v35, %v218_v36 }
 0x1cb   :  { %v220_v37 = vsel %vm219_vm6, %v217_v35, %v218_v36 }
 0x1cc   :  { %v221_v38 = vrot.slane %v220_v37, 1 }
 0x1ce   :  { %vm222_vm7 = vcmp.lt.s32.totalorder %v220_v37, %v221_v38 }
 0x1cf   :  { %v223_v39 = vsel %vm222_vm7, %v220_v37, %v221_v38 }
 0x1d0   :  { %224 = vst [vmem:[#allocation8] sm:$0x1] %v223_v39 }
 0x1d1   :  { %379 = shalt.err (!%p376_p5)
}
 0x1d2   :  { %254 = dma.vmem_to_hbm [thread:$0]  %s252_s21, 16, %s476_s7, [#allocation7]  }
 0x1d3   :  { %390 = dma.done.wait [#allocation4], 64  }
 0x1d4   :  { %391 = vsyncadd [#allocation4], 4294967232 }
 0x1d5   :  { %392 = dma.done.wait [#allocation7], 80  }
 0x1d6   :  { %393 = vsyncadd [#allocation7], 4294967216 }
 0x1d7   :  { %264 = vsyncpa [#allocation3], 1 }
 0x1d8   :  { %265 = vsyncpa [#allocation4], 1 }
 0x1d9   :  { %266 = vsyncpa [#allocation7], 1 }

</bundles_post_ra>
